<compile_context>
chip_gen: v5e
topology: v5e:2x2
jax: 0.10.0
libtpu: 0.0.40
codegen_flags: <defaults>
</compile_context>

<pallas_src>
import math

import jax
import jax.numpy as jnp
from jax.experimental import pallas as pl
from jax.experimental.pallas import tpu as pltpu

_LANE = 128


def _residual_kernel(x_ref, w_ref, b_ref, o_ref):
    # x_ref: (rb, T)  rows = g folded batches x C channels, lanes = spatial
    # w_ref: (rb, rb) block-diagonal pointwise-conv weight, resident
    # b_ref: (rb, 1)  stacked bias column, resident
    x = x_ref[...]
    y = jnp.dot(w_ref[...], x, preferred_element_type=jnp.float32)   # (rb, T)
    y = y + b_ref[...].astype(jnp.float32)                           # bias bcast over lanes
    o_ref[...] = (y + x.astype(jnp.float32)).astype(o_ref.dtype)


def residual_pointwise(x_nchw, w, b, *, tile_hw=None, per_buffer_bytes=1 << 20):
    """Conv2d(C, C, kernel_size=1)(x) + x, fused in one Pallas kernel.

    x_nchw : (N, C, H, W)
    w      : (C, C) 1x1-conv weight, (out_ch, in_ch)
    b      : (C,)   bias
    """
    N, C, H, W = x_nchw.shape
    HW = H * W
    dtype = x_nchw.dtype
    itemsize = jnp.dtype(dtype).itemsize

    # Sublane quantum for this dtype (8 rows f32, 16 bf16, 32 int8).  Fold
    # g batches so the row-block height rb fills whole sublane tiles.
    sub = 8 * max(1, 4 // itemsize)
    rb = C * sub // math.gcd(C, sub)          # lcm(C, sub)
    g = rb // C                               # batches folded per row-block

    # (N, C, H, W) -> (N*C, HW): contiguous reshape — no transpose, no copy.
    x2 = x_nchw.reshape(N * C, HW)

    # Tile sizing against the REAL footprint:
    #   2 * rb*itemsize*tile_hw (input dbuf) + 2 * rb*itemsize*tile_hw (output
    #   dbuf) + ~2 * rb*4*tile_hw (f32 intermediates) + (rb,rb) weight + bias.
    # Target ~1 MiB per input buffer -> ~6-8 MiB total: safe under v5e's
    # 16 MiB scoped VMEM default, plenty of grid steps for v6e pipelining and
    # v7x megacore.
    if tile_hw is None:
        t = (per_buffer_bytes // (rb * itemsize)) // _LANE * _LANE
        tile_hw = max(_LANE, min(t, pl.cdiv(HW, _LANE) * _LANE))
    assert tile_hw % _LANE == 0

    # Block-diagonal weight (g copies of W) + stacked bias, built once (tiny).
    # TODO(synk): for very large C, tile C_out (multiples of 256) instead of
    # keeping the full (rb, rb) weight resident.
    w_blk = jnp.kron(jnp.eye(g, dtype=w.dtype), w)        # (rb, rb)
    b_blk = jnp.tile(b, g).reshape(rb, 1)                  # (rb, 1)

    # No padding: ragged tails are masked tail blocks.  Lane columns are
    # independent, and valid rows always form whole C-groups (N*C is a
    # multiple of C and rb = g*C), so garbage pad rows/lanes only feed
    # garbage outputs whose stores are masked off.
    grid = (pl.cdiv(N * C, rb), pl.cdiv(HW, tile_hw))

    out2 = pl.pallas_call(
        _residual_kernel,
        out_shape=jax.ShapeDtypeStruct((N * C, HW), dtype),
        grid_spec=pltpu.PrefetchScalarGridSpec(
            num_scalar_prefetch=0,
            grid=grid,
            in_specs=[
                pl.BlockSpec((rb, tile_hw), lambda r, p: (r, p)),   # x tile
                pl.BlockSpec((rb, rb), lambda r, p: (0, 0)),        # weight
                pl.BlockSpec((rb, 1), lambda r, p: (0, 0)),         # bias
            ],
            out_specs=pl.BlockSpec((rb, tile_hw), lambda r, p: (r, p)),
        ),
        compiler_params=pltpu.CompilerParams(
            # Both axes independent -> shardable across the 2 TCs on v7x.
            dimension_semantics=("parallel", "parallel")),
    )(x2, w_blk, b_blk)

    return out2.reshape(N, C, H, W)


if __name__ == "__main__":
    key = jax.random.PRNGKey(0)
    kx, kw, kb = jax.random.split(key, 3)

    # NOTE: tiny demo shape (8 KB) — launch + per-step overhead dominates here;
    # benchmark bandwidth/tiling conclusions on shapes with >= tens of MB.
    N, C, H, W = 2, 4, 16, 16
    x = jax.random.normal(kx, (N, C, H, W), dtype=jnp.float32)
    # Deterministic "fn" parameters: 1x1 conv weight (C_out, C_in) + bias.
    w = jax.random.normal(kw, (C, C), dtype=jnp.float32) * 0.1
    b = jax.random.normal(kb, (C,), dtype=jnp.float32) * 0.1

    out = residual_pointwise(x, w, b)
    out = jax.block_until_ready(out)

    # Pure-JAX reference: fn(x) + x with fn = pointwise conv.
    ref = jnp.einsum("nchw,oc->nohw", x, w) + b.reshape(1, C, 1, 1) + x
    assert out.shape == (N, C, H, W)
    assert jnp.allclose(out, ref, atol=1e-5, rtol=1e-5), "mismatch vs reference"

    print("KERNEL_OK")
</pallas_src>

<mosaic_0001>
module attributes {stable_mosaic.version = 11 : i64} {
  func.func @_residual_kernel(%arg0: i32, %arg1: i32, %arg2: memref<8x256xf32, #tpu.memory_space<vmem>>, %arg3: memref<8x8xf32, #tpu.memory_space<vmem>>, %arg4: memref<8x1xf32, #tpu.memory_space<vmem>>, %arg5: memref<8x256xf32, #tpu.memory_space<vmem>>) attributes {dimension_semantics = [#tpu.dimension_semantics<parallel>, #tpu.dimension_semantics<parallel>], iteration_bounds = array<i64: 1, 1>, scalar_prefetch = 0 : i64, scratch_operands = 0 : i64, tpu.core_type = #tpu.core_type<tc>, window_params = [{transform_indices = @transform_0, window_bounds = array<i64: 8, 256>}, {pipeline_mode = #tpu.pipeline_mode<synchronous>, transform_indices = @transform_1, window_bounds = array<i64: 8, 8>}, {pipeline_mode = #tpu.pipeline_mode<synchronous>, transform_indices = @transform_2, window_bounds = array<i64: 8, 1>}, {transform_indices = @transform_3, window_bounds = array<i64: 8, 256>}]} {
    %c0 = arith.constant 0 : index
    %c0_0 = arith.constant 0 : index
    %0 = vector.load %arg2[%c0, %c0_0] : memref<8x256xf32, #tpu.memory_space<vmem>>, vector<8x256xf32>
    %c0_1 = arith.constant 0 : index
    %c0_2 = arith.constant 0 : index
    %1 = vector.load %arg3[%c0_1, %c0_2] : memref<8x8xf32, #tpu.memory_space<vmem>>, vector<8x8xf32>
    %cst = arith.constant dense<0.000000e+00> : vector<8x256xf32>
    %2 = tpu.matmul %1, %0, %cst {dimension_numbers = #tpu.dot_dimension_numbers<[1], [0], [0], [1], [0, 0, 1, 1], [], []>} : vector<8x8xf32>, vector<8x256xf32>, vector<8x256xf32> -> vector<8x256xf32>
    %c0_3 = arith.constant 0 : index
    %c0_4 = arith.constant 0 : index
    %3 = vector.load %arg4[%c0_3, %c0_4] : memref<8x1xf32, #tpu.memory_space<vmem>>, vector<8x1xf32>
    %4 = vector.broadcast %3 : vector<8x1xf32> to vector<8x256xf32>
    %5 = arith.addf %2, %4 : vector<8x256xf32>
    %6 = arith.addf %5, %0 : vector<8x256xf32>
    %c0_5 = arith.constant 0 : index
    %c0_6 = arith.constant 0 : index
    %7 = vector.load %arg5[%c0_5, %c0_6] : memref<8x256xf32, #tpu.memory_space<vmem>>, vector<8x256xf32>
    tpu.vector_store %arg5[%c0_5, %c0_6], %6 {strides = array<i32>} : memref<8x256xf32, #tpu.memory_space<vmem>>, vector<8x256xf32>,
    return
  }
  func.func @transform_0(%arg0: i32, %arg1: i32) -> (i32, i32) {
    %c0_i32 = arith.constant 0 : i32
    return %arg0, %arg1 : i32, i32
  }
  func.func @transform_1(%arg0: i32, %arg1: i32) -> (i32, i32) {
    %c0_i32 = arith.constant 0 : i32
    %c0_i32_0 = arith.constant 0 : i32
    %c0_i32_1 = arith.constant 0 : i32
    return %c0_i32, %c0_i32_0 : i32, i32
  }
  func.func @transform_2(%arg0: i32, %arg1: i32) -> (i32, i32) {
    %c0_i32 = arith.constant 0 : i32
    %c0_i32_0 = arith.constant 0 : i32
    %c0_i32_1 = arith.constant 0 : i32
    return %c0_i32, %c0_i32_0 : i32, i32
  }
  func.func @transform_3(%arg0: i32, %arg1: i32) -> (i32, i32) {
    %c0_i32 = arith.constant 0 : i32
    return %arg0, %arg1 : i32, i32
  }
}

</mosaic_0001>

<bundles_post_ra>
// kernel: tpu_custom_call.1
= control target key start
LH: loop header
LB: loop body
LE: loop exit
PB: predicated region body
PF: predicated region fallthrough
CT: control target
= control target key end

     0   :  { %8 = vsyncpa [#allocation3], 0  ;;  %s196_s0 = inlined_call_operand.hbm [shape: f32[8,256], index: 0, kind: input, shape index: {}]   ;;  %s197_s1 = inlined_call_operand.vmem [shape: f32[8,8], index: 1, kind: input, shape index: {}]   ;;  %s198_s2 = inlined_call_operand.vmem [shape: f32[8,1], index: 2, kind: input, shape index: {}]   ;;  %s199_s3 = inlined_call_operand.hbm [shape: f32[8,256], index: 3, kind: output, shape index: {}]  }
   0x1   :  { %9 = vsyncpa [#allocation4], 0  ;;  %s15_s14 = sshll.u32 %s196_s0, 4  ;;  %s161_s15 = smov [#allocation2]   ;;  %s16_s14 = int_to_ptr.hbm [resolvable:$true] %s15_s14 }
   0x2   :  { %s17_s16 = sshll.u32 %s161_s15, 4  ;;  %s18_s16 = int_to_ptr.vmem [resolvable:$true] %s17_s16 }
   0x3   :  { %20 = dma.hbm_to_vmem [thread:$0]  %s16_s14, 256, %s18_s16, [#allocation3]  }
   0x4   :  { %157 = dma.done.wait [#allocation3], 256  }
   0x5   :  { %158 = vsyncadd [#allocation3], 4294967040  ;;  %v162_v0 = vmov 0   ;;  %vm38_vm0 = vcmask 64512   ;;  %v29_v1 = vld [vmem:[#allocation2] sm:$0xff]  ;;  %v30_v2 = vld [vmem:[#allocation2 + $0x8] sm:$0xff] }
   0x6   :  { %108 = vset.pattern.permute.xlu0 %v162_v0  ;;  %v31_v3 = vld [vmem:[%s197_s1] sm:$0xff]  ;;  %57 = vmatpush.msra.mxu0 %v29_v1  ;;  %s163_s20 = smov [#allocation5]   ;;  %s93_s1 = sshll.u32 %s199_s3, 4  ;;  %s94_s1 = int_to_ptr.hbm [resolvable:$true] %s93_s1 }
   0x7   :  { %77 = vmatpush.msra.mxu1 %v30_v2  ;;  %v32_v4 = vld [vmem:[%s198_s2] sm:$0xff]  ;;  %103 = vmatmul.msk.f32.vlgmr.msra.gmra.mxu0 %vm38_vm0, %v31_v3  ;;  %s91_s21 = sshll.u32 %s163_s20, 4  ;;  %s92_s21 = int_to_ptr.vmem [resolvable:$true] %s91_s21 }
   0x8   :  { %104 = vmatmul.msk.f32.vlgmr.msra.gmra.mxu1 %vm38_vm0, %v31_v3  ;;  %35 = vperm.xlu0 %108, %v32_v4  }
  0x7a   :  { %v36_v5 = vpop.permute.xlu0 %35 }
  0x84   :  { %v59_v6 = vpop.f32.mrf.mxu0 }
  0x85   :  { %v79_v7 = vpop.f32.mrf.mxu1  ;;  %v60_v8 = vadd.f32 %v59_v6, %v36_v5 }
  0x86   :  { %v80_v9 = vadd.f32 %v79_v7, %v36_v5 }
  0x87   :  { %v82_v10 = vadd.f32 %v60_v8, %v29_v1 }
  0x88   :  { %v83_v11 = vadd.f32 %v80_v9, %v30_v2 }
  0x89   :  { %84 = vst [vmem:[#allocation5] sm:$0xff] %v82_v10 }
  0x8a   :  { %85 = vst [vmem:[#allocation5 + $0x8] sm:$0xff] %v83_v11 }
  0x8b   :  { %96 = dma.vmem_to_hbm [thread:$0]  %s92_s21, 256, %s94_s1, [#allocation4]  }
  0x8c   :  { %159 = dma.done.wait [#allocation4], 256  }
  0x8d   :  { %160 = vsyncadd [#allocation4], 4294967040 }
  0x8e   :  { %101 = vsyncpa [#allocation3], 1 }
  0x8f   :  { %102 = vsyncpa [#allocation4], 1 }

</bundles_post_ra>
